<compile_context>
chip_gen: v7x
topology: tpu7x:2x2x1
jax: 0.10.0
libtpu: 0.0.40
codegen_flags: <defaults>
</compile_context>

<pallas_src>
import functools

import jax
import jax.numpy as jnp
from jax.experimental import pallas as pl
from jax.experimental.pallas import tpu as pltpu


def _make_hloss_kernel(b_total: int, tile_rows: int):
    inv_b = 1.0 / float(b_total)

    def kernel(x_ref, o_ref, acc_ref):
        i = pl.program_id(0)

        @pl.when(i == 0)
        def _init():
            acc_ref[0] = jnp.float32(0.0)

        x = x_ref[...].astype(jnp.float32)                       # (TB, C)

        # Mask rows of the (possibly ragged) last tile.
        row_ids = i * tile_rows + jax.lax.broadcasted_iota(
            jnp.int32, (tile_rows, 1), 0)                        # (TB, 1)
        valid = row_ids < b_total                                # (TB, 1)
        x = jnp.where(valid, x, 0.0)                             # keep padding finite

        # Stable entropy:  sum_c p*logp = sum_c(e*z)/s - log(s)
        m = jnp.max(x, axis=1, keepdims=True)                    # (TB, 1)
        z = x - m
        e = jnp.exp(z)
        s = jnp.sum(e, axis=1, keepdims=True)                    # (TB, 1)
        ez = jnp.sum(e * z, axis=1, keepdims=True)               # (TB, 1)
        # Per-row divide only (exact reciprocal; approx=True would move it to
        # the EUP slot but exactness is kept for the 1e-5 tolerance check).
        row = ez * pl.reciprocal(s) - jnp.log(s)                 # (TB, 1)
        row = jnp.where(valid, row, 0.0)

        acc_ref[0] = acc_ref[0] + jnp.sum(row)

        @pl.when(i == pl.num_programs(0) - 1)
        def _finalize():
            o_ref[0, 0] = -acc_ref[0] * inv_b                    # -mean over true B

    return kernel


def _choose_tile_rows(b: int, c: int, itemsize: int) -> int:
    # Target ~2 MiB per input tile (=> ~4 MiB double-buffered), capped at 1024
    # rows; always a multiple of 8 sublanes when tiling is actually needed.
    target_bytes = 2 * 1024 * 1024
    tb = target_bytes // max(1, c * itemsize)
    tb = int(min(tb, 1024))
    tb = max((tb // 8) * 8, 8)
    if b <= tb:
        return b          # single tile: block equals full batch dim
    return tb


@functools.partial(jax.jit, static_argnames=("tile_rows",))
def hloss(x, tile_rows: int | None = None):
    """Entropy loss:  -mean_b( sum_c softmax(x) * log_softmax(x) )."""
    B, C = x.shape
    if tile_rows is None:
        tb = _choose_tile_rows(B, C, x.dtype.itemsize)
    else:
        tb = min(int(tile_rows), B)
        if tb < B:
            tb = max((tb // 8) * 8, 8)   # keep sublane-aligned tiles
    num_tiles = pl.cdiv(B, tb)

    out = pl.pallas_call(
        _make_hloss_kernel(B, tb),
        out_shape=jax.ShapeDtypeStruct((1, 1), jnp.float32),
        grid=(num_tiles,),
        in_specs=[pl.BlockSpec((tb, C), lambda i: (i, 0))],
        out_specs=pl.BlockSpec(memory_space=pltpu.SMEM),
        scratch_shapes=[pltpu.SMEM((1,), jnp.float32)],
        compiler_params=pltpu.CompilerParams(
            dimension_semantics=("arbitrary",),      # running accumulator axis
            vmem_limit_bytes=32 * 1024 * 1024,
        ),
    )(x)
    return out[0, 0]


def _ref_hloss(x):
    p = jax.nn.softmax(x, axis=1)
    lp = jax.nn.log_softmax(x, axis=1)
    return -1.0 * jnp.mean(jnp.sum(p * lp, axis=1))


if __name__ == "__main__":
    key = jax.random.PRNGKey(0)
    k1, k2 = jax.random.split(key)

    # Case 1: small shape matching the module's use (single-tile path).
    B, C = 8, 32
    x = jax.random.normal(k1, (B, C), dtype=jnp.float32)
    result = jax.block_until_ready(hloss(x))
    ref = _ref_hloss(x)
    assert jnp.allclose(result, ref, atol=1e-5, rtol=1e-5), (result, ref)

    # Case 2: force batch tiling with a ragged last tile (exercises the
    # pipelined accumulator + row masking path).
    B2, C2 = 20, 32
    x2 = jax.random.normal(k2, (B2, C2), dtype=jnp.float32)
    result2 = jax.block_until_ready(hloss(x2, tile_rows=8))
    ref2 = _ref_hloss(x2)
    assert jnp.allclose(result2, ref2, atol=1e-5, rtol=1e-5), (result2, ref2)

    print("KERNEL_OK")
</pallas_src>

<mosaic_0001>
module attributes {stable_mosaic.version = 11 : i64} {
  func.func @kernel(%arg0: i32, %arg1: memref<8x32xf32, #tpu.memory_space<vmem>>, %arg2: memref<1x1xf32, #tpu.memory_space<smem>>, %arg3: memref<1xf32, #tpu.memory_space<smem>>) attributes {dimension_semantics = [#tpu.dimension_semantics<arbitrary>], iteration_bounds = array<i64: 1>, scalar_prefetch = 0 : i64, scratch_operands = 1 : i64, tpu.core_type = #tpu.core_type<tc>, window_params = [{transform_indices = @transform_0, window_bounds = array<i64: 8, 32>}, {transform_indices = @transform_1, window_bounds = array<i64: 1, 1>}]} {
    %c0_i32 = arith.constant 0 : i32
    %0 = arith.cmpi eq, %arg0, %c0_i32 : i32
    %1 = arith.extui %0 : i1 to i32
    %c0_i32_0 = arith.constant 0 : i32
    %2 = arith.cmpi ne, %1, %c0_i32_0 : i32
    scf.if %2 {
      %cst_12 = arith.constant 0.000000e+00 : f32
      %c0_13 = arith.constant 0 : index
      %40 = memref.load %arg3[%c0_13] : memref<1xf32, #tpu.memory_space<smem>>
      memref.store %cst_12, %arg3[%c0_13] : memref<1xf32, #tpu.memory_space<smem>>
    } else {
    }
    %c0 = arith.constant 0 : index
    %c0_1 = arith.constant 0 : index
    %3 = vector.load %arg1[%c0, %c0_1] : memref<8x32xf32, #tpu.memory_space<vmem>>, vector<8x32xf32>
    %c8_i32 = arith.constant 8 : i32
    %4 = arith.muli %arg0, %c8_i32 : i32
    %5 = tpu.iota {dimensions = array<i32: 0>} : vector<8x1xi32>
    %6 = vector.broadcast %4 : i32 to vector<8x1xi32>
    %7 = arith.addi %6, %5 : vector<8x1xi32>
    %c8_i32_2 = arith.constant 8 : i32
    %8 = vector.broadcast %c8_i32_2 : i32 to vector<8x1xi32>
    %9 = arith.cmpi slt, %7, %8 : vector<8x1xi32>
    %cst = arith.constant 0.000000e+00 : f32
    %10 = vector.shape_cast %9 : vector<8x1xi1> to vector<8x1xi1>
    %11 = vector.broadcast %10 : vector<8x1xi1> to vector<8x32xi1>
    %12 = vector.broadcast %cst : f32 to vector<8x32xf32>
    %13 = arith.select %11, %3, %12 : vector<8x32xi1>, vector<8x32xf32>
    %cst_3 = arith.constant dense<0xFF800000> : vector<8xf32>
    %14 = vector.multi_reduction <maximumf>, %13, %cst_3 [1] : vector<8x32xf32> to vector<8xf32>
    %15 = vector.shape_cast %14 : vector<8xf32> to vector<8x1xf32>
    %16 = vector.broadcast %15 : vector<8x1xf32> to vector<8x32xf32>
    %17 = arith.subf %13, %16 : vector<8x32xf32>
    %18 = math.exp %17 : vector<8x32xf32>
    %cst_4 = arith.constant dense<0.000000e+00> : vector<8xf32>
    %19 = vector.multi_reduction <add>, %18, %cst_4 [1] : vector<8x32xf32> to vector<8xf32>
    %20 = vector.shape_cast %19 : vector<8xf32> to vector<8x1xf32>
    %21 = arith.mulf %18, %17 : vector<8x32xf32>
    %cst_5 = arith.constant dense<0.000000e+00> : vector<8xf32>
    %22 = vector.multi_reduction <add>, %21, %cst_5 [1] : vector<8x32xf32> to vector<8xf32>
    %23 = vector.shape_cast %22 : vector<8xf32> to vector<8x1xf32>
    %24 = tpu.reciprocal %20 : vector<8x1xf32> -> vector<8x1xf32>
    %25 = arith.mulf %23, %24 : vector<8x1xf32>
    %26 = math.log %20 : vector<8x1xf32>
    %27 = arith.subf %25, %26 : vector<8x1xf32>
    %cst_6 = arith.constant 0.000000e+00 : f32
    %28 = vector.broadcast %cst_6 : f32 to vector<8x1xf32>
    %29 = arith.select %9, %27, %28 : vector<8x1xi1>, vector<8x1xf32>
    %c0_7 = arith.constant 0 : index
    %30 = memref.load %arg3[%c0_7] : memref<1xf32, #tpu.memory_space<smem>>
    %31 = vector.shape_cast %29 : vector<8x1xf32> to vector<1x8x1xf32>
    %cst_8 = arith.constant dense<0.000000e+00> : vector<1xf32>
    %32 = vector.multi_reduction <add>, %31, %cst_8 [1, 2] : vector<1x8x1xf32> to vector<1xf32>
    %33 = vector.shape_cast %32 : vector<1xf32> to vector<1x1x1xf32>
    %34 = vector.extract %33[0, 0, 0] : f32 from vector<1x1x1xf32>
    %35 = arith.addf %30, %34 : f32
    %c0_9 = arith.constant 0 : index
    %36 = memref.load %arg3[%c0_9] : memref<1xf32, #tpu.memory_space<smem>>
    memref.store %35, %arg3[%c0_9] : memref<1xf32, #tpu.memory_space<smem>>
    %c0_i32_10 = arith.constant 0 : i32
    %37 = arith.cmpi eq, %arg0, %c0_i32_10 : i32
    %38 = arith.extui %37 : i1 to i32
    %c0_i32_11 = arith.constant 0 : i32
    %39 = arith.cmpi ne, %38, %c0_i32_11 : i32
    scf.if %39 {
      %c0_12 = arith.constant 0 : index
      %40 = memref.load %arg3[%c0_12] : memref<1xf32, #tpu.memory_space<smem>>
      %cst_13 = arith.constant 0.000000e+00 : f32
      %41 = arith.subf %cst_13, %40 : f32
      %cst_14 = arith.constant 1.250000e-01 : f32
      %42 = arith.mulf %41, %cst_14 : f32
      %c0_15 = arith.constant 0 : index
      %c0_16 = arith.constant 0 : index
      %43 = memref.load %arg2[%c0_15, %c0_16] : memref<1x1xf32, #tpu.memory_space<smem>>
      memref.store %42, %arg2[%c0_15, %c0_16] : memref<1x1xf32, #tpu.memory_space<smem>>
    } else {
    }
    return
  }
  func.func @transform_0(%arg0: i32) -> (i32, i32) {
    %c0_i32 = arith.constant 0 : i32
    %c0_i32_0 = arith.constant 0 : i32
    return %arg0, %c0_i32 : i32, i32
  }
  func.func @transform_1(%arg0: i32) -> (i32, i32) {
    %c0_i32 = arith.constant 0 : i32
    %c0_i32_0 = arith.constant 0 : i32
    %c0_i32_1 = arith.constant 0 : i32
    return %c0_i32, %c0_i32_0 : i32, i32
  }
}

</mosaic_0001>

<bundles_post_ra>
// kernel: hloss.1
= control target key start
LH: loop header
LB: loop body
LE: loop exit
PB: predicated region body
PF: predicated region fallthrough
CT: control target
= control target key end

     0   :  { %6 = vsyncpa [#allocation4], 0  ;;  %s176_s0 = inlined_call_operand.hbm [shape: f32[8,32], index: 0, kind: input, shape index: {}]   ;;  %s177_s1 = inlined_call_operand.hbm [shape: f32[1,1], index: 1, kind: output, shape index: {}]  }
   0x1   :  { %7 = vsyncpa [#allocation5], 0  ;;  %s140_s6 = smov [#allocation3]   ;;  %s104_s10 = scalar_lea.hbm %s176_s0, 128 }
   0x2   :  { %s14_s7 = sshll.u32 %s140_s6, 4  ;;  %p105_p0 = scmp.ne.s32.totalorder %s176_s0, %s104_s10  ;;  %s15_s7 = int_to_ptr.vmem [resolvable:$true] %s14_s7 }
   0x3   :  { %p108_p1 = scmp.lt.u32.totalorder %s104_s10, %s176_s0 }
   0x5   :  { %p110_p2 = pnand %p108_p1, %p105_p0 }
   0x7   :  { %113 = shalt.err (!%p110_p2)
}
   0x8   :  { %s114_s15 = scalar_lea.vmem %s15_s7, 128  ;;  %p119_p4 = scmp.lt.s32.totalorder %s15_s7, %s15_s7 }
   0x9   :  { %p115_p3 = scmp.ne.s32.totalorder %s15_s7, %s114_s15  ;;  %p120_p5 = scmp.lt.s32.totalorder %s114_s15, %s114_s15 }
   0xb   :  { %p121_p6 = por %p120_p5, %p119_p4 }
   0xd   :  { %p122_p7 = pnand %p121_p6, %p115_p3 }
   0xf   :  { %125 = shalt.err (!%p122_p7)
}
  0x10   :  { %17 = dma.hbm_to_vmem [thread:$0]  %s176_s0, 128, %s15_s7, [#allocation4]  }
  0x11   :  { %136 = dma.done.wait [#allocation4], 128  }
  0x12   :  { %137 = vsyncadd [#allocation4], 4294967168  ;;  %vm37_vm0 = vcmask 261120   ;;  %v27_v0 = vld [vmem:[#allocation3] sm:$0xff]  ;;  %vm58_vm1 = vcmask 7168   ;;  %s126_s22 = scalar_lea.hbm %s177_s1, 16 }
  0x13   :  { %v38_v1 = vsel %vm37_vm0, %v27_v0, -inf  ;;  %p127_p8 = scmp.ne.s32.totalorder %s177_s1, %s126_s22  ;;  %p130_p9 = scmp.lt.u32.totalorder %s126_s22, %s177_s1 }
  0x14   :  { %39 = vmax.xlane.f32.xlu0 %v38_v1 }
  0x15   :  { %p132_p10 = pnand %p130_p9, %p127_p8 }
  0xa1   :  { %v40_v2 = vpop.xlane.xlu0 %39 }
  0xa2   :  { %v41_v3 = vsub.f32 %v27_v0, %v40_v2 }
  0xa4   :  { %v42_v4 = vmul.f32 1.442695, %v41_v3 }
  0xa6   :  { %98 = vpow2.f32 %v42_v4 }
  0xb0   :  { %v99_v5 = vpop.eup %98 }
  0xb1   :  { %v44_v6 = vsel %vm37_vm0, %v99_v5, 0.0  ;;  %v47_v7 = vmul.f32 %v99_v5, %v41_v3 }
  0xb2   :  { %45 = vadd.xlane.f32.xlu0 %v44_v6 }
  0xb3   :  { %v48_v8 = vsel %vm37_vm0, %v47_v7, 0.0 }
  0xb4   :  { %49 = vadd.xlane.f32.xlu1 %v48_v8 }
 0x13f   :  { %v46_v9 = vpop.xlane.xlu0 %45 }
 0x140   :  { %100 = vrcp.f32 %v46_v9 }
 0x141   :  { %102 = vlog2.f32 %v46_v9  ;;  %v50_v11 = vpop.xlane.xlu1 %49 }
 0x14a   :  { %v101_v10 = vpop.eup %100 }
 0x14b   :  { %v103_v12 = vpop.eup %102  ;;  %v52_v13 = vmul.f32 %v101_v10, %v50_v11 }
 0x14c   :  { %v54_v14 = vmul.f32 0.6931472, %v103_v12 }
 0x14e   :  { %v55_v15 = vsub.f32 %v52_v13, %v54_v14 }
 0x150   :  { %v59_v16 = vsel %vm58_vm1, %v55_v15, 0.0 }
 0x151   :  { %60 = vadd.xlane.f32.xlu1 %v59_v16 }
 0x1de   :  { %v61_v17 = vpop.xlane.xlu1 %60 }
 0x1df   :  { %v62_v18 = vrot.slane %v61_v17, 4 }
 0x1e1   :  { %v63_v19 = vadd.f32 %v62_v18, %v61_v17 }
 0x1e3   :  { %v64_v20 = vrot.slane %v63_v19, 2 }
 0x1e5   :  { %v65_v21 = vadd.f32 %v64_v20, %v63_v19 }
 0x1e7   :  { %v66_v22 = vrot.slane %v65_v21, 1 }
 0x1e9   :  { %v67_v23 = vadd.f32 %v66_v22, %v65_v21 }
 0x1eb   :  { %94 = vpush %v67_v23 }
 0x21c   :  { %s95_s0 = spop %94 }
 0x21d   :  { %s76_s18 = ssub.f32 0.0, %s95_s0 }
 0x21f   :  { %s77_s19 = smul.f32 0.125, %s76_s18 }
 0x221   :  { %79 = sst [smem:[#allocation6]] %s77_s19 }
 0x222   :  { %135 = shalt.err (!%p132_p10)
}
 0x223   :  { %s141_s27 = smov [#allocation6]  }
 0x224   :  { %87 = dma.smem_to_hbm %s141_s27, 16, %s177_s1, [#allocation5]  }
 0x225   :  { %138 = dma.done.wait [#allocation5], 16  }
 0x226   :  { %139 = vsyncadd [#allocation5], 4294967280 }
 0x227   :  { %91 = sfence }
 0x228   :  { %92 = vsyncpa [#allocation4], 1 }
 0x229   :  { %93 = vsyncpa [#allocation5], 1 }

</bundles_post_ra>
